<compile_context>
chip_gen: v5e
topology: v5e:2x2
jax: 0.10.0
libtpu: 0.0.40
codegen_flags: <defaults>
</compile_context>

<pallas_src>
import math
import functools

import numpy as np
import jax
import jax.numpy as jnp
from jax.experimental import pallas as pl
from jax.experimental.pallas import tpu as pltpu


# -----------------------------------------------------------------------------
# Pallas kernel: one (batch, q-tile) per grid step.
# -----------------------------------------------------------------------------
def mha_rope_kernel(x_ref, cos_ref, sin_ref, bias_ref,
                    wq_ref, wk_ref, wv_ref, wo_ref, bo_ref,
                    o_ref, k_rot_ref, v_ref, *, n_heads, d_head, q_tile):
    H, D, tq = n_heads, d_head, q_tile
    Dh = D // 2
    bf = jnp.bfloat16
    qi = pl.program_id(1)

    def to_heads(t2d):
        # (rows, E=H*D) -> (H, rows, D).  Static per-head slices + stack
        # (safe Mosaic lowering; no (1,0,2) transpose needed).
        return jnp.stack([t2d[:, h * D:(h + 1) * D] for h in range(H)], axis=0)

    def rope(t3, cos, sin):
        # t3: (H, rows, D) f32 with per-head [re..., im...] column layout
        # (arranged in the wrapper); cos/sin: (1, rows, Dh).
        re, im = t3[..., :Dh], t3[..., Dh:]
        return jnp.concatenate([re * cos - im * sin,
                                re * sin + im * cos], axis=-1)

    # ---- K / V for the whole sequence: computed once per batch element. ----
    @pl.when(qi == 0)
    def _():
        x_all = x_ref[0]                                        # (S, E) bf16
        cos_all = cos_ref[...]                                  # (1, S, Dh)
        sin_all = sin_ref[...]
        xk = jnp.dot(x_all, wk_ref[...], preferred_element_type=jnp.float32)
        xv = jnp.dot(x_all, wv_ref[...], preferred_element_type=jnp.float32)
        k_rot_ref[...] = rope(to_heads(xk), cos_all, sin_all).astype(bf)
        v_ref[...] = to_heads(xv).astype(bf)

    # ---- Q tile (scale already folded into wq in the wrapper). ----
    r0 = pl.multiple_of(qi * tq, tq)
    x_q = x_ref[0, pl.ds(r0, tq), :]                            # (tq, E) bf16
    cos_q = cos_ref[0, pl.ds(r0, tq), :][None]                  # (1, tq, Dh)
    sin_q = sin_ref[0, pl.ds(r0, tq), :][None]
    xq = jnp.dot(x_q, wq_ref[...], preferred_element_type=jnp.float32)
    q_rot = rope(to_heads(xq), cos_q, sin_q).astype(bf)         # (H, tq, D)

    # ---- Scores: single head-batched einsum, contraction on last dim. ----
    s = jnp.einsum('hqd,hkd->hqk', q_rot, k_rot_ref[...],
                   preferred_element_type=jnp.float32)          # (H, tq, S)
    s = s + bias_ref[...]                                       # (1, 1, S) key-padding bias

    # ---- Softmax: un-normalized p; normalize the (much smaller) context. ----
    m = jnp.max(s, axis=-1, keepdims=True)
    p = jnp.exp(s - m)
    l = jnp.sum(p, axis=-1, keepdims=True)                      # (H, tq, 1)

    ctx = jnp.einsum('hqk,hkd->hqd', p.astype(bf), v_ref[...],
                     preferred_element_type=jnp.float32)        # (H, tq, D)
    ctx = ctx * pl.reciprocal(l, approx=True)                   # EUP slot

    # ---- Output projection: one full-K (tq,E)@(E,E) matmul. ----
    ctx2 = jnp.concatenate([ctx[h] for h in range(H)], axis=-1).astype(bf)  # (tq, E)
    out = jnp.dot(ctx2, wo_ref[...], preferred_element_type=jnp.float32) + bo_ref[0]
    o_ref[0] = out.astype(o_ref.dtype)


# -----------------------------------------------------------------------------
# One-time parameter preparation (outside the per-call path).
# -----------------------------------------------------------------------------
def prepare_mha_rope_params(params, n_heads):
    E = params["wq"].shape[0]
    D = E // n_heads
    scale = 1.0 / math.sqrt(D)

    # Per-head column permutation of q/k outputs: interleaved (re, im) pairs
    # -> [re..., im...] so RoPE becomes a half-split elementwise op.  Scores
    # are invariant to a shared per-head feature permutation of q and k.
    perm = np.concatenate([
        np.concatenate([np.arange(h * D, (h + 1) * D, 2),
                        np.arange(h * D + 1, (h + 1) * D, 2)])
        for h in range(n_heads)
    ])

    wq_t = params["wq"].astype(jnp.float32).T        # nn.Linear: y = x @ W.T
    wk_t = params["wk"].astype(jnp.float32).T
    wv_t = params["wv"].astype(jnp.float32).T
    wo_t = params["wo"].astype(jnp.float32).T

    return {
        # 1/sqrt(D) folded into wq in f32 before the bf16 cast.
        "wq": (wq_t[:, perm] * scale).astype(jnp.bfloat16),
        "wk": wk_t[:, perm].astype(jnp.bfloat16),
        "wv": wv_t.astype(jnp.bfloat16),
        "wo": wo_t.astype(jnp.bfloat16),
        "bo": params["bo"].reshape(1, E).astype(jnp.float32),
    }


def _pick_q_tile(S, target=128):
    if S <= target:
        return S
    best = S
    for t in range(8, target + 1, 8):
        if S % t == 0:
            best = t
    return best


# -----------------------------------------------------------------------------
# Wrapper: per-call plumbing (cos/sin, mask bias) + pallas_call.
# -----------------------------------------------------------------------------
def mha_rope_pallas(x, key_padding_mask, dt, prepared, n_heads,
                    q_tile=None, out_dtype=jnp.float32):
    B, S, E = x.shape
    D = E // n_heads
    Dh = D // 2
    tq = q_tile if q_tile is not None else _pick_q_tile(S)
    assert S % tq == 0

    # precompute_freqs_cis(d_head, S, dt=dt): freqs[b, s, j] = dt[b, s] * base[j]
    base = 1.0 / (10000.0 ** (jnp.arange(0, D, 2, dtype=jnp.float32)[:Dh] / D))
    freqs = jnp.einsum("bk,j->bkj", dt.astype(jnp.float32), base)   # (B, S, Dh)
    cos = jnp.cos(freqs)
    sin = jnp.sin(freqs)

    # Key padding mask (True == padded) -> large finite negative bias.
    bias = jnp.where(key_padding_mask, -1e30, 0.0).astype(jnp.float32)
    bias = bias.reshape(B, 1, S)

    x_b = x.astype(jnp.bfloat16)

    kernel = functools.partial(mha_rope_kernel, n_heads=n_heads, d_head=D,
                               q_tile=tq)

    # Grid-invariant weights: single-buffered (no double-buffer VMEM copy).
    def w_spec(shape):
        zeros = (0,) * len(shape)
        return pl.BlockSpec(shape, lambda b, q: zeros,
                            pipeline_mode=pl.Buffered(1))

    return pl.pallas_call(
        kernel,
        out_shape=jax.ShapeDtypeStruct((B, S, E), out_dtype),
        grid=(B, S // tq),
        in_specs=[
            pl.BlockSpec((1, S, E), lambda b, q: (b, 0, 0)),     # x (bf16)
            pl.BlockSpec((1, S, Dh), lambda b, q: (b, 0, 0)),    # cos
            pl.BlockSpec((1, S, Dh), lambda b, q: (b, 0, 0)),    # sin
            pl.BlockSpec((1, 1, S), lambda b, q: (b, 0, 0)),     # mask bias
            w_spec((E, E)),                                      # wq (perm+scale, bf16)
            w_spec((E, E)),                                      # wk (perm, bf16)
            w_spec((E, E)),                                      # wv (bf16)
            w_spec((E, E)),                                      # wo (bf16)
            w_spec((1, E)),                                      # bo (f32)
        ],
        out_specs=pl.BlockSpec((1, tq, E), lambda b, q: (b, q, 0)),
        scratch_shapes=[
            pltpu.VMEM((n_heads, S, D), jnp.bfloat16),           # rotated K cache
            pltpu.VMEM((n_heads, S, D), jnp.bfloat16),           # V cache
        ],
        compiler_params=pltpu.CompilerParams(
            # q-tile axis must stay "arbitrary": K/V scratch is filled at qi==0.
            dimension_semantics=("parallel", "arbitrary"),
            vmem_limit_bytes=48 * 1024 * 1024),
    )(x_b, cos, sin, bias,
      prepared["wq"], prepared["wk"], prepared["wv"], prepared["wo"],
      prepared["bo"])


# -----------------------------------------------------------------------------
# Pure-JAX reference (mirrors the PyTorch forward, eval mode).
# -----------------------------------------------------------------------------
def mha_rope_reference(x, key_padding_mask, dt, params, n_heads):
    B, S, E = x.shape
    D = E // n_heads
    Dh = D // 2

    xq = x @ params["wq"].T
    xk = x @ params["wk"].T
    xv = x @ params["wv"].T
    xq = xq.reshape(B, S, n_heads, D)
    xk = xk.reshape(B, S, n_heads, D)
    xv = xv.reshape(B, S, n_heads, D)

    base = 1.0 / (10000.0 ** (jnp.arange(0, D, 2, dtype=jnp.float32)[:Dh] / D))
    freqs = jnp.einsum("bk,j->bkj", dt.astype(jnp.float32), base)   # (B, S, Dh)
    cos = jnp.cos(freqs)[:, :, None, :]
    sin = jnp.sin(freqs)[:, :, None, :]

    def rope(t):
        tr = t.reshape(B, S, n_heads, Dh, 2)
        a, b = tr[..., 0], tr[..., 1]
        out = jnp.stack([a * cos - b * sin, a * sin + b * cos], axis=-1)
        return out.reshape(B, S, n_heads, D)

    xq, xk = rope(xq), rope(xk)

    q = xq.transpose(0, 2, 1, 3)
    k = xk.transpose(0, 2, 1, 3)
    v = xv.transpose(0, 2, 1, 3)

    scale = 1.0 / math.sqrt(D)
    s = jnp.einsum("bhld,bhsd->bhls", q, k) * scale
    s = jnp.where(key_padding_mask[:, None, None, :], -jnp.inf, s)
    p = jax.nn.softmax(s, axis=-1)
    o = jnp.einsum("bhls,bhsd->bhld", p, v)
    o = o.transpose(0, 2, 1, 3).reshape(B, S, E)
    return o @ params["wo"].T + params["bo"]


# -----------------------------------------------------------------------------
if __name__ == "__main__":
    B, S = 2, 8
    embed_dim, num_heads = 32, 4

    key = jax.random.PRNGKey(0)
    kx, kq, kk, kv, ko, kb, kd = jax.random.split(key, 7)

    x = jax.random.normal(kx, (B, S, embed_dim), dtype=jnp.float32)

    params = {
        "wq": 0.05 * jax.random.normal(kq, (embed_dim, embed_dim), jnp.float32),
        "wk": 0.05 * jax.random.normal(kk, (embed_dim, embed_dim), jnp.float32),
        "wv": 0.05 * jax.random.normal(kv, (embed_dim, embed_dim), jnp.float32),
        "wo": 0.05 * jax.random.normal(ko, (embed_dim, embed_dim), jnp.float32),
        "bo": 0.05 * jax.random.normal(kb, (embed_dim,), jnp.float32),
    }

    # key_padding_mask: True == padded key position (batch 1 has 2 padded keys).
    key_padding_mask = jnp.array(
        [[False] * S,
         [False] * (S - 2) + [True] * 2])

    # dt: per-(batch, position) "time" values used by precompute_freqs_cis.
    dt = (jnp.tile(jnp.arange(S, dtype=jnp.float32)[None, :], (B, 1))
          + 0.1 * jax.random.uniform(kd, (B, S), dtype=jnp.float32))

    # One-time weight preparation (hoisted out of the per-call path).
    prepared = prepare_mha_rope_params(params, num_heads)

    out = mha_rope_pallas(x, key_padding_mask, dt, prepared, num_heads)
    out = jax.block_until_ready(out)

    ref = mha_rope_reference(x, key_padding_mask, dt, params, num_heads)
    ref = jax.block_until_ready(ref)

    np.testing.assert_allclose(np.asarray(out), np.asarray(ref),
                               rtol=1e-2, atol=1e-2)
    print("KERNEL_OK")
</pallas_src>

<mosaic_0001>
module attributes {stable_mosaic.version = 11 : i64} {
  func.func @mha_rope_kernel(%arg0: i32, %arg1: i32, %arg2: memref<1x8x32xbf16, #tpu.memory_space<vmem>>, %arg3: memref<1x8x4xf32, #tpu.memory_space<vmem>>, %arg4: memref<1x8x4xf32, #tpu.memory_space<vmem>>, %arg5: memref<1x1x8xf32, #tpu.memory_space<vmem>>, %arg6: memref<32x32xbf16, #tpu.memory_space<vmem>>, %arg7: memref<32x32xbf16, #tpu.memory_space<vmem>>, %arg8: memref<32x32xbf16, #tpu.memory_space<vmem>>, %arg9: memref<32x32xbf16, #tpu.memory_space<vmem>>, %arg10: memref<1x32xf32, #tpu.memory_space<vmem>>, %arg11: memref<1x8x32xf32, #tpu.memory_space<vmem>>, %arg12: memref<4x8x8xbf16, #tpu.memory_space<vmem>>, %arg13: memref<4x8x8xbf16, #tpu.memory_space<vmem>>) attributes {dimension_semantics = [#tpu.dimension_semantics<parallel>, #tpu.dimension_semantics<arbitrary>], iteration_bounds = array<i64: 2, 1>, scalar_prefetch = 0 : i64, scratch_operands = 2 : i64, tpu.core_type = #tpu.core_type<tc>, window_params = [{transform_indices = @transform_0, window_bounds = array<i64: 1, 8, 32>}, {transform_indices = @transform_1, window_bounds = array<i64: 1, 8, 4>}, {transform_indices = @transform_2, window_bounds = array<i64: 1, 8, 4>}, {transform_indices = @transform_3, window_bounds = array<i64: 1, 1, 8>}, {pipeline_mode = #tpu.pipeline_mode<synchronous>, transform_indices = @transform_4, window_bounds = array<i64: 32, 32>}, {pipeline_mode = #tpu.pipeline_mode<synchronous>, transform_indices = @transform_5, window_bounds = array<i64: 32, 32>}, {pipeline_mode = #tpu.pipeline_mode<synchronous>, transform_indices = @transform_6, window_bounds = array<i64: 32, 32>}, {pipeline_mode = #tpu.pipeline_mode<synchronous>, transform_indices = @transform_7, window_bounds = array<i64: 32, 32>}, {pipeline_mode = #tpu.pipeline_mode<synchronous>, transform_indices = @transform_8, window_bounds = array<i64: 1, 32>}, {transform_indices = @transform_9, window_bounds = array<i64: 1, 8, 32>}]} {
    %c0_i32 = arith.constant 0 : i32
    %0 = arith.cmpi eq, %arg1, %c0_i32 : i32
    %1 = arith.extui %0 : i1 to i32
    %c0_i32_0 = arith.constant 0 : i32
    %2 = arith.cmpi ne, %1, %c0_i32_0 : i32
    scf.if %2 {
      %c0_29 = arith.constant 0 : index
      %c0_30 = arith.constant 0 : index
      %c0_31 = arith.constant 0 : index
      %79 = vector.load %arg2[%c0_29, %c0_30, %c0_31] : memref<1x8x32xbf16, #tpu.memory_space<vmem>>, vector<1x8x32xbf16>
      %80 = vector.shape_cast %79 : vector<1x8x32xbf16> to vector<8x32xbf16>
      %c0_32 = arith.constant 0 : index
      %c0_33 = arith.constant 0 : index
      %c0_34 = arith.constant 0 : index
      %81 = vector.load %arg3[%c0_32, %c0_33, %c0_34] : memref<1x8x4xf32, #tpu.memory_space<vmem>>, vector<1x8x4xf32>
      %c0_35 = arith.constant 0 : index
      %c0_36 = arith.constant 0 : index
      %c0_37 = arith.constant 0 : index
      %82 = vector.load %arg4[%c0_35, %c0_36, %c0_37] : memref<1x8x4xf32, #tpu.memory_space<vmem>>, vector<1x8x4xf32>
      %c0_38 = arith.constant 0 : index
      %c0_39 = arith.constant 0 : index
      %83 = vector.load %arg7[%c0_38, %c0_39] : memref<32x32xbf16, #tpu.memory_space<vmem>>, vector<32x32xbf16>
      %cst_40 = arith.constant dense<0.000000e+00> : vector<8x32xf32>
      %84 = tpu.matmul %80, %83, %cst_40 {dimension_numbers = #tpu.dot_dimension_numbers<[1], [0], [0], [1], [0, 0, 1, 1], [], []>} : vector<8x32xbf16>, vector<32x32xbf16>, vector<8x32xf32> -> vector<8x32xf32>
      %c0_41 = arith.constant 0 : index
      %c0_42 = arith.constant 0 : index
      %85 = vector.load %arg8[%c0_41, %c0_42] : memref<32x32xbf16, #tpu.memory_space<vmem>>, vector<32x32xbf16>
      %cst_43 = arith.constant dense<0.000000e+00> : vector<8x32xf32>
      %86 = tpu.matmul %80, %85, %cst_43 {dimension_numbers = #tpu.dot_dimension_numbers<[1], [0], [0], [1], [0, 0, 1, 1], [], []>} : vector<8x32xbf16>, vector<32x32xbf16>, vector<8x32xf32> -> vector<8x32xf32>
      %87 = vector.extract_strided_slice %84 {offsets = [0, 0], sizes = [8, 8], strides = [1, 1]} : vector<8x32xf32> to vector<8x8xf32>
      %88 = vector.extract_strided_slice %84 {offsets = [0, 8], sizes = [8, 8], strides = [1, 1]} : vector<8x32xf32> to vector<8x8xf32>
      %89 = vector.extract_strided_slice %84 {offsets = [0, 16], sizes = [8, 8], strides = [1, 1]} : vector<8x32xf32> to vector<8x8xf32>
      %90 = vector.extract_strided_slice %84 {offsets = [0, 24], sizes = [8, 8], strides = [1, 1]} : vector<8x32xf32> to vector<8x8xf32>
      %91 = vector.shape_cast %87 : vector<8x8xf32> to vector<1x8x8xf32>
      %92 = vector.shape_cast %88 : vector<8x8xf32> to vector<1x8x8xf32>
      %93 = vector.shape_cast %89 : vector<8x8xf32> to vector<1x8x8xf32>
      %94 = vector.shape_cast %90 : vector<8x8xf32> to vector<1x8x8xf32>
      %95 = tpu.concatenate %91, %92, %93, %94 in 0 : vector<1x8x8xf32>, vector<1x8x8xf32>, vector<1x8x8xf32>, vector<1x8x8xf32> -> vector<4x8x8xf32>
      %96 = vector.extract_strided_slice %95 {offsets = [0, 0, 0], sizes = [4, 8, 4], strides = [1, 1, 1]} : vector<4x8x8xf32> to vector<4x8x4xf32>
      %97 = vector.extract_strided_slice %95 {offsets = [0, 0, 4], sizes = [4, 8, 4], strides = [1, 1, 1]} : vector<4x8x8xf32> to vector<4x8x4xf32>
      %98 = vector.broadcast %81 : vector<1x8x4xf32> to vector<4x8x4xf32>
      %99 = arith.mulf %96, %98 : vector<4x8x4xf32>
      %100 = vector.broadcast %82 : vector<1x8x4xf32> to vector<4x8x4xf32>
      %101 = arith.mulf %97, %100 : vector<4x8x4xf32>
      %102 = arith.subf %99, %101 : vector<4x8x4xf32>
      %103 = vector.broadcast %82 : vector<1x8x4xf32> to vector<4x8x4xf32>
      %104 = arith.mulf %96, %103 : vector<4x8x4xf32>
      %105 = vector.broadcast %81 : vector<1x8x4xf32> to vector<4x8x4xf32>
      %106 = arith.mulf %97, %105 : vector<4x8x4xf32>
      %107 = arith.addf %104, %106 : vector<4x8x4xf32>
      %108 = tpu.concatenate %102, %107 in 2 : vector<4x8x4xf32>, vector<4x8x4xf32> -> vector<4x8x8xf32>
      %109 = arith.truncf %108 : vector<4x8x8xf32> to vector<4x8x8xbf16>
      %c0_44 = arith.constant 0 : index
      %c0_45 = arith.constant 0 : index
      %c0_46 = arith.constant 0 : index
      %110 = vector.load %arg12[%c0_44, %c0_45, %c0_46] : memref<4x8x8xbf16, #tpu.memory_space<vmem>>, vector<4x8x8xbf16>
      tpu.vector_store %arg12[%c0_44, %c0_45, %c0_46], %109 {strides = array<i32>} : memref<4x8x8xbf16, #tpu.memory_space<vmem>>, vector<4x8x8xbf16>,
      %111 = vector.extract_strided_slice %86 {offsets = [0, 0], sizes = [8, 8], strides = [1, 1]} : vector<8x32xf32> to vector<8x8xf32>
      %112 = vector.extract_strided_slice %86 {offsets = [0, 8], sizes = [8, 8], strides = [1, 1]} : vector<8x32xf32> to vector<8x8xf32>
      %113 = vector.extract_strided_slice %86 {offsets = [0, 16], sizes = [8, 8], strides = [1, 1]} : vector<8x32xf32> to vector<8x8xf32>
      %114 = vector.extract_strided_slice %86 {offsets = [0, 24], sizes = [8, 8], strides = [1, 1]} : vector<8x32xf32> to vector<8x8xf32>
      %115 = vector.shape_cast %111 : vector<8x8xf32> to vector<1x8x8xf32>
      %116 = vector.shape_cast %112 : vector<8x8xf32> to vector<1x8x8xf32>
      %117 = vector.shape_cast %113 : vector<8x8xf32> to vector<1x8x8xf32>
      %118 = vector.shape_cast %114 : vector<8x8xf32> to vector<1x8x8xf32>
      %119 = tpu.concatenate %115, %116, %117, %118 in 0 : vector<1x8x8xf32>, vector<1x8x8xf32>, vector<1x8x8xf32>, vector<1x8x8xf32> -> vector<4x8x8xf32>
      %120 = arith.truncf %119 : vector<4x8x8xf32> to vector<4x8x8xbf16>
      %c0_47 = arith.constant 0 : index
      %c0_48 = arith.constant 0 : index
      %c0_49 = arith.constant 0 : index
      %121 = vector.load %arg13[%c0_47, %c0_48, %c0_49] : memref<4x8x8xbf16, #tpu.memory_space<vmem>>, vector<4x8x8xbf16>
      tpu.vector_store %arg13[%c0_47, %c0_48, %c0_49], %120 {strides = array<i32>} : memref<4x8x8xbf16, #tpu.memory_space<vmem>>, vector<4x8x8xbf16>,
    } else {
    }
    %c8_i32 = arith.constant 8 : i32
    %3 = arith.muli %arg1, %c8_i32 : i32
    %4 = tpu.assume_multiple %3, 8 : i32
    %c0 = arith.constant 0 : index
    %5 = arith.index_cast %4 : i32 to index
    %c0_1 = arith.constant 0 : index
    %6 = vector.load %arg2[%c0, %5, %c0_1] : memref<1x8x32xbf16, #tpu.memory_space<vmem>>, vector<1x8x32xbf16>
    %7 = vector.shape_cast %6 : vector<1x8x32xbf16> to vector<8x32xbf16>
    %c0_2 = arith.constant 0 : index
    %8 = arith.index_cast %4 : i32 to index
    %c0_3 = arith.constant 0 : index
    %9 = vector.load %arg3[%c0_2, %8, %c0_3] : memref<1x8x4xf32, #tpu.memory_space<vmem>>, vector<1x8x4xf32>
    %10 = vector.shape_cast %9 : vector<1x8x4xf32> to vector<8x4xf32>
    %11 = vector.shape_cast %10 : vector<8x4xf32> to vector<1x8x4xf32>
    %c0_4 = arith.constant 0 : index
    %12 = arith.index_cast %4 : i32 to index
    %c0_5 = arith.constant 0 : index
    %13 = vector.load %arg4[%c0_4, %12, %c0_5] : memref<1x8x4xf32, #tpu.memory_space<vmem>>, vector<1x8x4xf32>
    %14 = vector.shape_cast %13 : vector<1x8x4xf32> to vector<8x4xf32>
    %15 = vector.shape_cast %14 : vector<8x4xf32> to vector<1x8x4xf32>
    %c0_6 = arith.constant 0 : index
    %c0_7 = arith.constant 0 : index
    %16 = vector.load %arg6[%c0_6, %c0_7] : memref<32x32xbf16, #tpu.memory_space<vmem>>, vector<32x32xbf16>
    %cst = arith.constant dense<0.000000e+00> : vector<8x32xf32>
    %17 = tpu.matmul %7, %16, %cst {dimension_numbers = #tpu.dot_dimension_numbers<[1], [0], [0], [1], [0, 0, 1, 1], [], []>} : vector<8x32xbf16>, vector<32x32xbf16>, vector<8x32xf32> -> vector<8x32xf32>
    %18 = vector.extract_strided_slice %17 {offsets = [0, 0], sizes = [8, 8], strides = [1, 1]} : vector<8x32xf32> to vector<8x8xf32>
    %19 = vector.extract_strided_slice %17 {offsets = [0, 8], sizes = [8, 8], strides = [1, 1]} : vector<8x32xf32> to vector<8x8xf32>
    %20 = vector.extract_strided_slice %17 {offsets = [0, 16], sizes = [8, 8], strides = [1, 1]} : vector<8x32xf32> to vector<8x8xf32>
    %21 = vector.extract_strided_slice %17 {offsets = [0, 24], sizes = [8, 8], strides = [1, 1]} : vector<8x32xf32> to vector<8x8xf32>
    %22 = vector.shape_cast %18 : vector<8x8xf32> to vector<1x8x8xf32>
    %23 = vector.shape_cast %19 : vector<8x8xf32> to vector<1x8x8xf32>
    %24 = vector.shape_cast %20 : vector<8x8xf32> to vector<1x8x8xf32>
    %25 = vector.shape_cast %21 : vector<8x8xf32> to vector<1x8x8xf32>
    %26 = tpu.concatenate %22, %23, %24, %25 in 0 : vector<1x8x8xf32>, vector<1x8x8xf32>, vector<1x8x8xf32>, vector<1x8x8xf32> -> vector<4x8x8xf32>
    %27 = vector.extract_strided_slice %26 {offsets = [0, 0, 0], sizes = [4, 8, 4], strides = [1, 1, 1]} : vector<4x8x8xf32> to vector<4x8x4xf32>
    %28 = vector.extract_strided_slice %26 {offsets = [0, 0, 4], sizes = [4, 8, 4], strides = [1, 1, 1]} : vector<4x8x8xf32> to vector<4x8x4xf32>
    %29 = vector.broadcast %11 : vector<1x8x4xf32> to vector<4x8x4xf32>
    %30 = arith.mulf %27, %29 : vector<4x8x4xf32>
    %31 = vector.broadcast %15 : vector<1x8x4xf32> to vector<4x8x4xf32>
    %32 = arith.mulf %28, %31 : vector<4x8x4xf32>
    %33 = arith.subf %30, %32 : vector<4x8x4xf32>
    %34 = vector.broadcast %15 : vector<1x8x4xf32> to vector<4x8x4xf32>
    %35 = arith.mulf %27, %34 : vector<4x8x4xf32>
    %36 = vector.broadcast %11 : vector<1x8x4xf32> to vector<4x8x4xf32>
    %37 = arith.mulf %28, %36 : vector<4x8x4xf32>
    %38 = arith.addf %35, %37 : vector<4x8x4xf32>
    %39 = tpu.concatenate %33, %38 in 2 : vector<4x8x4xf32>, vector<4x8x4xf32> -> vector<4x8x8xf32>
    %40 = arith.truncf %39 : vector<4x8x8xf32> to vector<4x8x8xbf16>
    %c0_8 = arith.constant 0 : index
    %c0_9 = arith.constant 0 : index
    %c0_10 = arith.constant 0 : index
    %41 = vector.load %arg12[%c0_8, %c0_9, %c0_10] : memref<4x8x8xbf16, #tpu.memory_space<vmem>>, vector<4x8x8xbf16>
    "tpu.trace_start"() <{level = 10 : i32, message = "hqd,hkd->hqk"}> : () -> ()
    %cst_11 = arith.constant dense<0.000000e+00> : vector<4x8x8xf32>
    %42 = tpu.matmul %40, %41, %cst_11 {dimension_numbers = #tpu.dot_dimension_numbers<[2], [2], [1], [1], [0, 0, 0, 1, 1, 1], [0], [0]>} : vector<4x8x8xbf16>, vector<4x8x8xbf16>, vector<4x8x8xf32> -> vector<4x8x8xf32>
    "tpu.trace_stop"() : () -> ()
    %c0_12 = arith.constant 0 : index
    %c0_13 = arith.constant 0 : index
    %c0_14 = arith.constant 0 : index
    %43 = vector.load %arg5[%c0_12, %c0_13, %c0_14] : memref<1x1x8xf32, #tpu.memory_space<vmem>>, vector<1x1x8xf32>
    %44 = vector.broadcast %43 : vector<1x1x8xf32> to vector<4x8x8xf32>
    %45 = arith.addf %42, %44 : vector<4x8x8xf32>
    %cst_15 = arith.constant dense<0xFF800000> : vector<4x8xf32>
    %46 = vector.multi_reduction <maximumf>, %45, %cst_15 [2] : vector<4x8x8xf32> to vector<4x8xf32>
    %47 = vector.shape_cast %46 : vector<4x8xf32> to vector<4x8x1xf32>
    %48 = vector.broadcast %47 : vector<4x8x1xf32> to vector<4x8x8xf32>
    %49 = arith.subf %45, %48 : vector<4x8x8xf32>
    %50 = math.exp %49 : vector<4x8x8xf32>
    %cst_16 = arith.constant dense<0.000000e+00> : vector<4x8xf32>
    %51 = vector.multi_reduction <add>, %50, %cst_16 [2] : vector<4x8x8xf32> to vector<4x8xf32>
    %52 = vector.shape_cast %51 : vector<4x8xf32> to vector<4x8x1xf32>
    %53 = arith.truncf %50 : vector<4x8x8xf32> to vector<4x8x8xbf16>
    %c0_17 = arith.constant 0 : index
    %c0_18 = arith.constant 0 : index
    %c0_19 = arith.constant 0 : index
    %54 = vector.load %arg13[%c0_17, %c0_18, %c0_19] : memref<4x8x8xbf16, #tpu.memory_space<vmem>>, vector<4x8x8xbf16>
    "tpu.trace_start"() <{level = 10 : i32, message = "hqk,hkd->hqd"}> : () -> ()
    %cst_20 = arith.constant dense<0.000000e+00> : vector<4x8x8xf32>
    %55 = tpu.matmul %53, %54, %cst_20 {dimension_numbers = #tpu.dot_dimension_numbers<[2], [1], [1], [2], [0, 0, 0, 1, 1, 2], [0], [0]>} : vector<4x8x8xbf16>, vector<4x8x8xbf16>, vector<4x8x8xf32> -> vector<4x8x8xf32>
    "tpu.trace_stop"() : () -> ()
    %56 = tpu.reciprocal %52 {approx = true} : vector<4x8x1xf32> -> vector<4x8x1xf32>
    %57 = vector.broadcast %56 : vector<4x8x1xf32> to vector<4x8x8xf32>
    %58 = arith.mulf %55, %57 : vector<4x8x8xf32>
    %59 = vector.extract_strided_slice %58 {offsets = [0, 0, 0], sizes = [1, 8, 8], strides = [1, 1, 1]} : vector<4x8x8xf32> to vector<1x8x8xf32>
    %60 = vector.shape_cast %59 : vector<1x8x8xf32> to vector<8x8xf32>
    %61 = vector.extract_strided_slice %58 {offsets = [1, 0, 0], sizes = [1, 8, 8], strides = [1, 1, 1]} : vector<4x8x8xf32> to vector<1x8x8xf32>
    %62 = vector.shape_cast %61 : vector<1x8x8xf32> to vector<8x8xf32>
    %63 = vector.extract_strided_slice %58 {offsets = [2, 0, 0], sizes = [1, 8, 8], strides = [1, 1, 1]} : vector<4x8x8xf32> to vector<1x8x8xf32>
    %64 = vector.shape_cast %63 : vector<1x8x8xf32> to vector<8x8xf32>
    %65 = vector.extract_strided_slice %58 {offsets = [3, 0, 0], sizes = [1, 8, 8], strides = [1, 1, 1]} : vector<4x8x8xf32> to vector<1x8x8xf32>
    %66 = vector.shape_cast %65 : vector<1x8x8xf32> to vector<8x8xf32>
    %67 = tpu.concatenate %60, %62, %64, %66 in 1 : vector<8x8xf32>, vector<8x8xf32>, vector<8x8xf32>, vector<8x8xf32> -> vector<8x32xf32>
    %68 = arith.truncf %67 : vector<8x32xf32> to vector<8x32xbf16>
    %c0_21 = arith.constant 0 : index
    %c0_22 = arith.constant 0 : index
    %69 = vector.load %arg9[%c0_21, %c0_22] : memref<32x32xbf16, #tpu.memory_space<vmem>>, vector<32x32xbf16>
    %cst_23 = arith.constant dense<0.000000e+00> : vector<8x32xf32>
    %70 = tpu.matmul %68, %69, %cst_23 {dimension_numbers = #tpu.dot_dimension_numbers<[1], [0], [0], [1], [0, 0, 1, 1], [], []>} : vector<8x32xbf16>, vector<32x32xbf16>, vector<8x32xf32> -> vector<8x32xf32>
    %c0_24 = arith.constant 0 : index
    %c0_25 = arith.constant 0 : index
    %71 = vector.load %arg10[%c0_24, %c0_25] : memref<1x32xf32, #tpu.memory_space<vmem>>, vector<1x32xf32>
    %72 = vector.shape_cast %71 : vector<1x32xf32> to vector<32xf32>
    %73 = vector.shape_cast %72 : vector<32xf32> to vector<1x32xf32>
    %74 = vector.broadcast %73 : vector<1x32xf32> to vector<8x32xf32>
    %75 = arith.addf %70, %74 : vector<8x32xf32>
    %c0_26 = arith.constant 0 : index
    %c0_27 = arith.constant 0 : index
    %c0_28 = arith.constant 0 : index
    %76 = vector.load %arg11[%c0_26, %c0_27, %c0_28] : memref<1x8x32xf32, #tpu.memory_space<vmem>>, vector<1x8x32xf32>
    %77 = vector.shape_cast %76 : vector<1x8x32xf32> to vector<8x32xf32>
    %78 = vector.shape_cast %75 : vector<8x32xf32> to vector<1x8x32xf32>
    tpu.vector_store %arg11[%c0_26, %c0_27, %c0_28], %78 {strides = array<i32>} : memref<1x8x32xf32, #tpu.memory_space<vmem>>, vector<1x8x32xf32>,
    return
  }
  func.func @transform_0(%arg0: i32, %arg1: i32) -> (i32, i32, i32) {
    %c0_i32 = arith.constant 0 : i32
    %c0_i32_0 = arith.constant 0 : i32
    %c0_i32_1 = arith.constant 0 : i32
    return %arg0, %c0_i32, %c0_i32_0 : i32, i32, i32
  }
  func.func @transform_1(%arg0: i32, %arg1: i32) -> (i32, i32, i32) {
    %c0_i32 = arith.constant 0 : i32
    %c0_i32_0 = arith.constant 0 : i32
    %c0_i32_1 = arith.constant 0 : i32
    return %arg0, %c0_i32, %c0_i32_0 : i32, i32, i32
  }
  func.func @transform_2(%arg0: i32, %arg1: i32) -> (i32, i32, i32) {
    %c0_i32 = arith.constant 0 : i32
    %c0_i32_0 = arith.constant 0 : i32
    %c0_i32_1 = arith.constant 0 : i32
    return %arg0, %c0_i32, %c0_i32_0 : i32, i32, i32
  }
  func.func @transform_3(%arg0: i32, %arg1: i32) -> (i32, i32, i32) {
    %c0_i32 = arith.constant 0 : i32
    %c0_i32_0 = arith.constant 0 : i32
    %c0_i32_1 = arith.constant 0 : i32
    return %arg0, %c0_i32, %c0_i32_0 : i32, i32, i32
  }
  func.func @transform_4(%arg0: i32, %arg1: i32) -> (i32, i32) {
    %c0_i32 = arith.constant 0 : i32
    %c0_i32_0 = arith.constant 0 : i32
    %c0_i32_1 = arith.constant 0 : i32
    return %c0_i32, %c0_i32_0 : i32, i32
  }
  func.func @transform_5(%arg0: i32, %arg1: i32) -> (i32, i32) {
    %c0_i32 = arith.constant 0 : i32
    %c0_i32_0 = arith.constant 0 : i32
    %c0_i32_1 = arith.constant 0 : i32
    return %c0_i32, %c0_i32_0 : i32, i32
  }
  func.func @transform_6(%arg0: i32, %arg1: i32) -> (i32, i32) {
    %c0_i32 = arith.constant 0 : i32
    %c0_i32_0 = arith.constant 0 : i32
    %c0_i32_1 = arith.constant 0 : i32
    return %c0_i32, %c0_i32_0 : i32, i32
  }
  func.func @transform_7(%arg0: i32, %arg1: i32) -> (i32, i32) {
    %c0_i32 = arith.constant 0 : i32
    %c0_i32_0 = arith.constant 0 : i32
    %c0_i32_1 = arith.constant 0 : i32
    return %c0_i32, %c0_i32_0 : i32, i32
  }
  func.func @transform_8(%arg0: i32, %arg1: i32) -> (i32, i32) {
    %c0_i32 = arith.constant 0 : i32
    %c0_i32_0 = arith.constant 0 : i32
    %c0_i32_1 = arith.constant 0 : i32
    return %c0_i32, %c0_i32_0 : i32, i32
  }
  func.func @transform_9(%arg0: i32, %arg1: i32) -> (i32, i32, i32) {
    %c0_i32 = arith.constant 0 : i32
    %c0_i32_0 = arith.constant 0 : i32
    return %arg0, %arg1, %c0_i32 : i32, i32, i32
  }
}

</mosaic_0001>

<bundles_post_ra>
// kernel: tpu_custom_call.1
= control target key start
LH: loop header
LB: loop body
LE: loop exit
PB: predicated region body
PF: predicated region fallthrough
CT: control target
= control target key end

     0   :  { %14 = vsyncpa [#allocation5], 0  ;;  %s1888_s0 = inlined_call_operand.vmem [shape: bf16[2,8,32], index: 0, kind: input, shape index: {}]   ;;  %s1889_s1 = inlined_call_operand.vmem [shape: f32[2,8,4], index: 1, kind: input, shape index: {}]   ;;  %s1890_s2 = inlined_call_operand.vmem [shape: f32[2,8,4], index: 2, kind: input, shape index: {}]   ;;  %s1891_s3 = inlined_call_operand.vmem [shape: f32[2,1,8], index: 3, kind: input, shape index: {}]   ;;  %s1892_s4 = inlined_call_operand.vmem [shape: bf16[32,32], index: 4, kind: input, shape index: {}]   ;;  %s1893_s5 = inlined_call_operand.vmem [shape: bf16[32,32], index: 5, kind: input, shape index: {}]   ;;  %s1894_s6 = inlined_call_operand.hbm [shape: bf16[32,32], index: 6, kind: input, shape index: {}]   ;;  %s1895_s7 = inlined_call_operand.hbm [shape: bf16[32,32], index: 7, kind: input, shape index: {}]   ;;  %s1896_s8 = inlined_call_operand.vmem [shape: f32[1,32], index: 8, kind: input, shape index: {}]   ;;  %s1897_s9 = inlined_call_operand.hbm [shape: f32[2,8,32], index: 9, kind: output, shape index: {}]  }
   0x1   :  { %15 = vsyncpa [#allocation8], 0 }
   0x2   :  { %16 = vsyncpa [#allocation6], 0 }
   0x3   :  { %18 = vsyncpa [#allocation6 + $0x1], 0  ;;  %s1566_s30 = smov 0   ;;  %s1568_s10 = smov 0  }
   0x4   :  { %s1570_s11 = smov 0   ;;  %s1572_s12 = smov 0  }
   0x5   :  { %s1574_s13 = smov 0   ;;  %s1576_s14 = smov 0  }
   0x6 LB: > { %1900 = sst [smem:[#allocation13_spill]] %s1498_s13  ;;  %s1173_s15 = sadd.s32 4294967295, %s1502_s14   ;;  %s1502_s14 = sphi %s1576_s14, %s24_s14   ;;  %s1498_s13 = sphi %s1574_s13, %s1907_s13   ;;  %s1494_s12 = sphi %s1572_s12, %s1906_s12   ;;  %s1490_s11 = sphi %s1570_s11, %s1910_s11   ;;  %s1486_s10 = sphi %s1568_s10, %s1909_s10   ;;  %s1482_s30 = sphi %s1566_s30, %s1908_s30  }
   0x7   : > { %s1174_s16 = sadd.s32 4294967294, %s1502_s14   ;;  %s36_s17 = sadd.s32 1, %s1498_s13 }
   0x8   : > { %s254_s18 = sadd.s32 1, %s1490_s11  ;;  %p38_p0 = scmp.ge.s32.totalorder %s36_s17, 2 }
   0x9   : > { %p264_p1 = scmp.ne.s32.totalorder %s1490_s11, %s1486_s10  ;;  %p265_p2 = scmp.eq.s32.totalorder %s1173_s15, 1 }
   0xa   : > { %p270_p3 = scmp.ne.s32.totalorder %s1486_s10, %s1482_s30  ;;  %s1912_s17 = smov (%p38_p0, %s36_s17), 0 }
   0xb   : > { %1901 = sst [smem:[#allocation14_spill]] %s1912_s17  ;;  %p1606_p4 = por %p265_p2, %p264_p1 }
   0xc   : > { %p271_p5 = scmp.eq.s32.totalorder %s1174_s16, 1  ;;  %s249_s20 = ssub.s32 %s1498_s13, %s1912_s17 }
   0xd   : > { %p1175_p6 = scmp.ge.s32.totalorder %s1502_s14, 1  ;;  %p252_p7 = scmp.eq.s32.totalorder %s249_s20, 0 }
   0xe   : > { %p1613_p8 = por %p271_p5, %p270_p3  ;;  %p278_p9 = scmp.lt.s32.totalorder %s1502_s14, 3 }
   0xf   : > { %s1619_s22 = scalar_select %p252_p7, %s1490_s11, %s254_s18  }
  0x10   : > { %p1621_p10 = pnand %p1175_p6, %p278_p9  ;;  %p1625_p11 = scmp.eq.s32.totalorder %s1173_s15, 0 }
  0x11   : > { %s295_s27 = sshll.u32 %s1894_s6, 4  ;;  %s1504_s28 = smov [#allocation4]   ;;  %s296_s27 = int_to_ptr.hbm [resolvable:$true] %s295_s27 }
  0x12   : > { %p1252_p12 = pneg %p1621_p10  ;;  %s297_s29 = sshll.u32 %s1504_s28, 4  ;;  %s298_s29 = int_to_ptr.vmem [resolvable:$true] %s297_s29 }
  0x13   : > { %s309_s15 = sshll.u32 %s1895_s7, 4  ;;  %s1505_s20 = smov 64   ;;  %s310_s15 = int_to_ptr.hbm [resolvable:$true] %s309_s15 }
  0x14   : > { %p1253_p13 = pnand %p1625_p11, %p1252_p12  ;;  %s1506_s17 = smov 4  }
  0x15   : > { %s1507_s13 = smov [#allocation7]   ;;  %357 = sbr.rel (%p1621_p10) target bundleno = 1196 (0x4ac), region = 56 }
  0x16   : > { %1255 = dma.hbm_to_vmem [thread:$0]  (!%p1253_p13), %s296_s27, 256, %s298_s29, [#allocation5], %s1505_s20, %s1505_s20, %s1506_s17  }
  0x17   : > { %s311_s25 = sshll.u32 %s1507_s13, 4  ;;  %s312_s25 = int_to_ptr.vmem [resolvable:$true] %s311_s25 }
  0x18   : > { %1258 = dma.hbm_to_vmem [thread:$0]  (!%p1253_p13), %s310_s15, 256, %s312_s25, [#allocation8], %s1505_s20, %s1505_s20, %s1506_s17  }
  0x1a   : > { %1469 = dma.done.wait (%p1625_p11), [#allocation5], 256  }
  0x1b   : > { %1471 = vsyncadd (%p1625_p11), [#allocation5], 4294967040 }
  0x1c   : > { %1473 = dma.done.wait (%p1625_p11), [#allocation8], 256  }
  0x1d   : > { %1475 = vsyncadd (%p1625_p11), [#allocation8], 4294967040  ;;  %p409_p0 = scmp.lt.s32.totalorder %s1494_s12, 1  ;;  %v1235_v0 = vld [vmem:[%s1893_s5 + $0x8] sm:$0xff]  ;;  %v1234_v2 = vld [vmem:[%s1893_s5] sm:$0xff]  ;;  %vm448_vm0 = vcmask 261120  }
  0x1e   : > { %v1239_v1 = vld [vmem:[%s1892_s4 + $0x8] sm:$0xff]  ;;  %458 = vmatpush.bf16.msra.mxu0 %v1235_v0  ;;  %v1238_v3 = vld [vmem:[%s1892_s4] sm:$0xff]  ;;  %s1508_s17 = smov 120   ;;  %s1509_s23 = smov 104   ;;  %vm584_vm1 = vcmask 31744   ;;  %vm593_vm2 = vcmask 60416  }
  0x1f   : > { %s1651_s13 = scalar_select %p409_p0, %s1494_s12, 1  ;;  %652 = vmatpush.bf16.msra.mxu2 %v1239_v1  ;;  %v1237_v42 = vld [vmem:[#allocation4 + $0x8] sm:$0xff]  ;;  %v1236_v43 = vld [vmem:[#allocation4] sm:$0xff]  ;;  %vm766_vm3 = vcmask 64512   ;;  %vm890_vm4 = vcmask 1043456   ;;  %vm985_vm5 = vcmask 130048  }
  0x20   : > { %s1510_s24 = smov 112   ;;  %s1511_s16 = smov 4   ;;  %487 = vmatpush.bf16.msra.mxu1 %v1237_v42  ;;  %vm987_vm6 = vcmask 195584  }
  0x21   : > { %s1183_s28 = sshll.u32 %s1651_s13, 2  ;;  %s1184_s26 = sshll.u32 %s1651_s13, 3 }
  0x22   : > { %s412_s25 = scalar_lea.vmem %s1888_s0, %s1183_s28  ;;  %459 = vmatpush.bf16.msra.mxu0 %v1234_v2  ;;  %s416_s29 = scalar_lea.vmem %s1889_s1, %s1184_s26 }
  0x23   : > { %653 = vmatpush.bf16.msra.mxu2 %v1238_v3  ;;  %v1669_v4 = vld [vmem:[%s412_s25] sm:$0xf]  ;;  %s420_s20 = scalar_lea.vmem %s1890_s2, %s1184_s26  ;;  %s423_s28 = scalar_lea.vmem %s1891_s3, %s1651_s13 }
  0x24   : > { %v621_v5 = vld [vmem:[%s412_s25] sm:$0xf]  ;;  %s1512_s25 = smov 124   ;;  %488 = vmatpush.bf16.msra.mxu1 %v1236_v43  ;;  %s1513_s13 = smov 16  }
  0x25   : > { %1194 = vmatmul.msk.bf16.vlgmr.msra.gmra.mxu0 %vm448_vm0, %v1669_v4  ;;  %v1688_v9 = vld [vmem:[%s416_s29] sm:$0xff]  ;;  %s1514_s29 = smov 8   ;;  %s1231_s18 = sshll.u32 %s1494_s12, 3 }
  0x26   : > { %1212 = vmatmul.msk.bf16.vlgmr.msra.gmra.mxu2 %vm448_vm0, %v621_v5  ;;  %v1703_v11 = vld [vmem:[%s420_s20] sm:$0xff]  ;;  %s1039_s26 = scalar_lea.hbm %s1897_s9, %s1231_s18 }
  0x27   : > { %1203 = vmatmul.msk.bf16.vlgmr.msra.gmra.mxu1 %vm448_vm0, %v1669_v4 }
  0xa2   : > { %v1674_v6 = vpop.f32.mrf.mxu0 }
  0xa3   : > { %495 = vrot.lane.b32.xlu1 %v1674_v6, %s1508_s17  ;;  %501 = vrot.lane.b32.xlu0 %v1674_v6, %s1509_s23  ;;  %v536_v59 = vmul.f32 %v1674_v6, %v1703_v11 }
  0xa4   : > { %v490_v43 = vpop.f32.mrf.mxu1 }
  0xa9   : > { %v1684_v7 = vpop.f32.mrf.mxu2 }
  0xaa   : > { %666 = vrot.lane.b32.xlu2 %v1684_v7, %s1509_s23  ;;  %v463_v8 = vpop.f32.mrf.mxu0  ;;  %v701_v1 = vmul.f32 %v1684_v7, %v1703_v11 }
  0xab   : > { %498 = vrot.lane.b32.xlu1 %v1674_v6, %s1510_s24  ;;  %541 = vrot.lane.b32.xlu0 %v1688_v9, %s1511_s16 }
  0xb1   : > { %v657_v10 = vpop.f32.mrf.mxu2 }
  0xb2   : > { %706 = vrot.lane.b32.xlu2 %v1688_v9, %s1511_s16 }
  0xb3   : > { %660 = vrot.lane.b32.xlu0 %v1684_v7, %s1508_s17  ;;  %663 = vrot.lane.b32.xlu1 %v1684_v7, %s1510_s24 }
  0xba   : > { %509 = vrot.lane.b32.xlu2 %v1703_v11, %s1511_s16 }
 0x104   : > { %v1711_v14 = vpop.permute.xlu2 %666 }
 0x105   : > { %v704_v48 = vmul.f32 %v1711_v14, %v1703_v11 }
 0x10c   : > { %v707_v20 = vpop.permute.xlu2 %706 }
 0x10d   : > { %v712_v23 = vmul.f32 %v707_v20, %v1711_v14  ;;  %v709_v31 = vmul.f32 %v707_v20, %v1684_v7 }
 0x114   : > { %v510_v26 = vpop.permute.xlu2 %509 }
 0x115   : > { %v1707_v12 = vpop.permute.xlu1 %495  ;;  %v1709_v13 = vpop.permute.xlu0 %501  ;;  %v512_v53 = vmul.f32 %v510_v26, %v1674_v6 }
 0x116   : > { %v515_v27 = vmul.f32 %v510_v26, %v1709_v13  ;;  %v513_v30 = vmul.f32 %v510_v26, %v1707_v12  ;;  %v539_v33 = vmul.f32 %v1709_v13, %v1703_v11  ;;  %v537_v35 = vmul.f32 %v1707_v12, %v1703_v11 }
 0x117   : > { %v505_v60 = vmul.f32 %v1707_v12, %v1688_v9  ;;  %v507_v10 = vmul.f32 %v1709_v13, %v1688_v9 }
 0x11d   : > { %v1713_v15 = vpop.permute.xlu1 %498  ;;  %v542_v16 = vpop.permute.xlu0 %541 }
 0x11e   : > { %v547_v17 = vmul.f32 %v542_v16, %v1709_v13  ;;  %v546_v18 = vmul.f32 %v542_v16, %v1713_v15  ;;  %v545_v19 = vmul.f32 %v542_v16, %v1707_v12  ;;  %v544_v28 = vmul.f32 %v542_v16, %v1674_v6 }
 0x11f   : > { %v514_v29 = vmul.f32 %v510_v26, %v1713_v15  ;;  %v538_v34 = vmul.f32 %v1713_v15, %v1703_v11 }
 0x120   : > { %558 = vrot.lane.b32.xlu0 %v547_v17, %s1512_s25  ;;  %556 = vrot.lane.b32.xlu2 %v546_v18, %s1512_s25 }
 0x121   : > { %554 = vrot.lane.b32.xlu1 %v545_v19, %s1512_s25  ;;  %v506_v19 = vmul.f32 %v1713_v15, %v1688_v9 }
 0x125   : > { %v1721_v21 = vpop.permute.xlu0 %660  ;;  %v1729_v24 = vpop.permute.xlu1 %663 }
 0x126   : > { %v710_v22 = vmul.f32 %v707_v20, %v1721_v21  ;;  %v711_v25 = vmul.f32 %v707_v20, %v1729_v24  ;;  %v703_v54 = vmul.f32 %v1729_v24, %v1703_v11  ;;  %v702_v56 = vmul.f32 %v1721_v21, %v1703_v11 }
 0x128   : > { %674 = vrot.lane.b32.xlu0 %v1703_v11, %s1511_s16  ;;  %719 = vrot.lane.b32.xlu2 %v710_v22, %s1512_s25 }
 0x129   : > { %723 = vrot.lane.b32.xlu1 %v712_v23, %s1512_s25 }
 0x130   : > { %721 = vrot.lane.b32.xlu0 %v711_v25, %s1512_s25  ;;  %526 = vrot.lane.b32.xlu2 %v515_v27, %s1512_s25 }
 0x131   : > { %552 = vrot.lane.b32.xlu1 %v544_v28, %s1512_s25 }
 0x138   : > { %524 = vrot.lane.b32.xlu2 %v514_v29, %s1512_s25 }
 0x139   : > { %522 = vrot.lane.b32.xlu1 %v513_v30, %s1512_s25 }
 0x141   : > { %717 = vrot.lane.b32.xlu1 %v709_v31, %s1512_s25 }
 0x17a   : > { %v557_v32 = vpop.permute.xlu2 %556 }
 0x17b   : > { %v566_v39 = vadd.f32 %v557_v32, %v538_v34 }
 0x182   : > { %v720_v55 = vpop.permute.xlu2 %719 }
 0x183   : > { %v730_v58 = vadd.f32 %v720_v55, %v702_v56 }
 0x18a   : > { %v527_v5 = vpop.permute.xlu2 %526 }
 0x18b   : > { %v535_v12 = vsub.f32 %v507_v10, %v527_v5 }
 0x192   : > { %v559_v36 = vpop.permute.xlu0 %558  ;;  %v525_v8 = vpop.permute.xlu2 %524 }
 0x193   : > { %v555_v37 = vpop.permute.xlu1 %554  ;;  %v567_v38 = vadd.f32 %v559_v36, %v539_v33  ;;  %v534_v22 = vsub.f32 %v506_v19, %v525_v8  ;;  %v672_v33 = vmul.f32 %v1711_v14, %v1688_v9 }
 0x194   : > { %v565_v40 = vadd.f32 %v555_v37, %v537_v35  ;;  %v504_v35 = vmul.f32 %v1674_v6, %v1688_v9  ;;  %v671_v6 = vmul.f32 %v1729_v24, %v1688_v9 }
 0x195   : > { %578 = vrot.lane.b32.xlu0 %v567_v38, %s1511_s16 }
 0x196   : > { %v1328_v41 = vpack.i.bf16 %v566_v39, %v565_v40 }
 0x19a   : > { %v675_v44 = vpop.permute.xlu0 %674 }
 0x19b   : > { %v724_v45 = vpop.permute.xlu1 %723  ;;  %v680_v46 = vmul.f32 %v675_v44, %v1711_v14  ;;  %v678_v47 = vmul.f32 %v675_v44, %v1721_v21  ;;  %v679_v51 = vmul.f32 %v675_v44, %v1729_v24  ;;  %v677_v3 = vmul.f32 %v675_v44, %v1684_v7 }
 0x19c   : > { %v732_v49 = vadd.f32 %v724_v45, %v704_v48 }
 0x19d   : > { %1329 = vrot.lane.b32.xlu0 %v1328_v41, %s1511_s16  ;;  %691 = vrot.lane.b32.xlu2 %v680_v46, %s1512_s25  ;;  %v608_v46 = vpack.c.bf16 %v490_v43, %v490_v43 }
 0x19e   : > { %687 = vrot.lane.b32.xlu1 %v678_v47, %s1512_s25  ;;  %v670_v47 = vmul.f32 %v1721_v21, %v1688_v9  ;;  %v492_v21 = vpop.f32.mrf.mxu1 }
 0x19f   : > { %612 = vst.msk [vmem:[#allocation3] sm:$0xf] %vm593_vm2, %v608_v46 }
 0x1a2   : > { %v722_v52 = vpop.permute.xlu0 %721 }
 0x1a3   : > { %v553_v50 = vpop.permute.xlu1 %552  ;;  %v731_v57 = vadd.f32 %v722_v52, %v703_v54 }
 0x1a4   : > { %v564_v61 = vadd.f32 %v553_v50, %v536_v59  ;;  %v669_v59 = vmul.f32 %v1684_v7, %v1688_v9  ;;  %v1338_v7 = vld [vmem:[%s423_s28] ss:$0 sm:$0xff] }
 0x1a5   : > { %743 = vrot.lane.b32.xlu0 %v732_v49, %s1511_s16  ;;  %689 = vrot.lane.b32.xlu2 %v679_v51, %s1512_s25  ;;  %v1333_v62 = vpack.i.bf16 %v731_v57, %v730_v58 }
 0x1a6   : > { %520 = vrot.lane.b32.xlu1 %v512_v53, %s1512_s25 }
 0x1ab   : > { %v523_v63 = vpop.permute.xlu1 %522 }
 0x1ac   : > { %v533_v0 = vsub.f32 %v505_v60, %v523_v63  ;;  %v883_v60 = vld [vmem:[#allocation3] sm:$0xf] }
 0x1ad   : > { %1334 = vrot.lane.b32.xlu0 %v1333_v62, %s1511_s16  ;;  %572 = vrot.lane.b32.xlu2 %v564_v61, %s1511_s16  ;;  %v892_v62 = vsel %vm890_vm4, %v883_v60, 0 }
 0x1b3   : > { %v718_v2 = vpop.permute.xlu1 %717 }
 0x1b4   : > { %v729_v4 = vadd.f32 %v718_v2, %v701_v1 }
 0x1b5   : > { %685 = vrot.lane.b32.xlu0 %v677_v3, %s1512_s25  ;;  %605 = vrot.lane.b32.xlu2 %v490_v43, %s1509_s23 }
 0x1b6   : > { %737 = vrot.lane.b32.xlu1 %v729_v4, %s1511_s16  ;;  %s406_s16 = sand.u32 1, %s1486_s10  }
 0x1b7   : > { %s1182_s15 = sshll.u32 %s406_s16, 3  ;;  %s1028_s12 = scalar_lea.sflag [#allocation6], %s406_s16 }
 0x1be   : > { %599 = vrot.lane.b32.xlu1 %v490_v43, %s1508_s17  ;;  %s408_s17 = scalar_lea.vmem [#allocation9], %s1182_s15  ;;  %s1436_s15 = scalar_lea.hbm %s1897_s9, 16 }
 0x1bf   : > { %s1041_s23 = sshll.u32 %s408_s17, 4  ;;  %s1042_s23 = int_to_ptr.vmem [resolvable:$true] %s1041_s23 }
 0x1c6   : > { %602 = vrot.lane.b32.xlu1 %v490_v43, %s1510_s24  ;;  %s1515_s24 = smov 24  }
 0x1f7   : > { %v692_v16 = vpop.permute.xlu2 %691 }
 0x1f8   : > { %v700_v15 = vsub.f32 %v672_v33, %v692_v16 }
 0x1ff   : > { %v690_v23 = vpop.permute.xlu2 %689 }
 0x200   : > { %v699_v50 = vsub.f32 %v671_v6, %v690_v23 }
 0x207   : > { %v579_v17 = vpop.permute.xlu0 %578  ;;  %v573_v40 = vpop.permute.xlu2 %572 }
 0x208   : > { %v588_v11 = vsel %vm584_vm1, %v535_v12, %v579_v17 }
 0x209   : > { %v592_v18 = vpack.c.bf16 %v588_v11, %v588_v11 }
 0x20b   : > { %597 = vst.msk [vmem:[#allocation2 + $0xc] sm:$0xf] %vm593_vm2, %v592_v18 }
 0x20f   : > { %v1330_v20 = vpop.permute.xlu0 %1329  ;;  %v606_v3 = vpop.permute.xlu2 %605 }
 0x210   : > { %v688_v25 = vpop.permute.xlu1 %687  ;;  %v1332_v26 = vunpack.i.h.bf16 %v1330_v20  ;;  %v1331_v27 = vunpack.i.l.bf16 %v1330_v20  ;;  %v611_v5 = vpack.c.bf16 %v606_v3, %v606_v3 }
 0x211   : > { %v698_v51 = vsub.f32 %v670_v47, %v688_v25 }
 0x212   : > { %v587_v13 = vsel %vm584_vm1, %v534_v22, %v1332_v26  ;;  %v586_v28 = vsel %vm584_vm1, %v533_v0, %v1331_v27  ;;  %v761_v29 = vld [vmem:[#allocation2 + $0xc] sm:$0xf]  ;;  %615 = vst.msk [vmem:[#allocation3 + $0xc] sm:$0xf] %vm593_vm2, %v611_v5 }
 0x213   : > { %v591_v30 = vpack.c.bf16 %v587_v13, %v587_v13  ;;  %v590_v31 = vpack.c.bf16 %v586_v28, %v586_v28  ;;  %v828_v32 = vsel %vm766_vm3, %v761_v29, 0 }
 0x214   : > { %837 = vmatpush.bf16.xpose.msrb.mxu2 %v828_v32 }
 0x215   : > { %596 = vst.msk [vmem:[#allocation2 + $0x8] sm:$0xf] %vm593_vm2, %v591_v30 }
 0x216   : > { %595 = vst.msk [vmem:[#allocation2 + $0x4] sm:$0xf] %vm593_vm2, %v590_v31 }
 0x217   : > { %v744_v34 = vpop.permute.xlu0 %743 }
 0x218   : > { %v753_v36 = vsel %vm584_vm1, %v700_v15, %v744_v34  ;;  %v521_v37 = vpop.permute.xlu1 %520 }
 0x219   : > { %v757_v38 = vpack.c.bf16 %v753_v36, %v753_v36  ;;  %v532_v39 = vsub.f32 %v504_v35, %v521_v37  ;;  %v886_v20 = vld [vmem:[#allocation3 + $0xc] sm:$0xf] }
 0x21a   : > { %v949_v23 = vsel %vm890_vm4, %v886_v20, 0 }
 0x21b   : > { %v585_v41 = vsel %vm584_vm1, %v532_v39, %v573_v40  ;;  %1216 = vmatmul.msk.bf16.vlgmr.msrb.gmra.mxu2 %vm766_vm3, %v757_v38 }
 0x21c   : > { %v589_v14 = vpack.c.bf16 %v585_v41, %v585_v41  ;;  %v760_v42 = vld [vmem:[#allocation2 + $0x8] sm:$0xf]  ;;  %958 = vmatpush.bf16.msra.mxu2 %v949_v23 }
 0x21d   : > { %v759_v44 = vld [vmem:[#allocation2 + $0x4] sm:$0xf]  ;;  %v809_v45 = vsel %vm766_vm3, %v760_v42, 0 }
 0x21e   : > { %594 = vst.msk [vmem:[#allocation2] sm:$0xf] %vm593_vm2, %v589_v14  ;;  %v790_v48 = vsel %vm766_vm3, %v759_v44, 0  ;;  %818 = vmatpush.bf16.xpose.msrb.mxu1 %v809_v45 }
 0x21f   : > { %799 = vmatpush.bf16.xpose.msrb.mxu0 %v790_v48  ;;  %v1335_v49 = vpop.permute.xlu0 %1334 }
 0x220   : > { %v1337_v52 = vunpack.i.h.bf16 %v1335_v49  ;;  %v1336_v53 = vunpack.i.l.bf16 %v1335_v49 }
 0x222   : > { %v752_v54 = vsel %vm584_vm1, %v699_v50, %v1337_v52  ;;  %v751_v24 = vsel %vm584_vm1, %v698_v51, %v1336_v53 }
 0x223   : > { %v756_v55 = vpack.c.bf16 %v752_v54, %v752_v54  ;;  %v755_v56 = vpack.c.bf16 %v751_v24, %v751_v24 }
 0x225   : > { %1215 = vmatmul.msk.bf16.vlgmr.msrb.gmra.mxu1 %vm766_vm3, %v756_v55  ;;  %v758_v57 = vld [vmem:[#allocation2] sm:$0xf] }
 0x226   : > { %1214 = vmatmul.msk.bf16.vlgmr.msrb.gmra.mxu0 %vm766_vm3, %v755_v56  ;;  %v771_v58 = vsel %vm766_vm3, %v758_v57, 0 }
 0x227   : > { %780 = vmatpush.bf16.xpose.msra.mxu3 %v771_v58  ;;  %v686_v61 = vpop.permute.xlu0 %685 }
 0x228   : > { %v697_v63 = vsub.f32 %v669_v59, %v686_v61  ;;  %v738_v0 = vpop.permute.xlu1 %737 }
 0x22a   : > { %v750_v1 = vsel %vm584_vm1, %v697_v63, %v738_v0 }
 0x22b   : > { %v754_v2 = vpack.c.bf16 %v750_v1, %v750_v1 }
 0x22e   : > { %1213 = vmatmul.msk.bf16.vlgmr.msra.gmra.mxu3 %vm766_vm3, %v754_v2 }
 0x22f   : > { %901 = vmatpush.bf16.msrb.mxu3 %v892_v62 }
 0x230   : > { %v600_v4 = vpop.permute.xlu1 %599 }
 0x231   : > { %v609_v8 = vpack.c.bf16 %v600_v4, %v600_v4 }
 0x233   : > { %613 = vst.msk [vmem:[#allocation3 + $0x4] sm:$0xf] %vm593_vm2, %v609_v8 }
 0x238   : > { %v603_v16 = vpop.permute.xlu1 %602 }
 0x239   : > { %v610_v11 = vpack.c.bf16 %v603_v16, %v603_v16 }
 0x23a   : > { %v884_v25 = vld [vmem:[#allocation3 + $0x4] sm:$0xf] }
 0x23b   : > { %614 = vst.msk [vmem:[#allocation3 + $0x8] sm:$0xf] %vm593_vm2, %v610_v11  ;;  %v911_v27 = vsel %vm890_vm4, %v884_v25, 0 }
 0x23c   : > { %920 = vmatpush.bf16.msra.mxu0 %v911_v27  ;;  %v1339_v27 = vld [vmem:[%s1896_s8] ss:$0 sm:$0xff] }
 0x242   : > { %v885_v31 = vld [vmem:[#allocation3 + $0x8] sm:$0xf] }
 0x243   : > { %v930_v32 = vsel %vm890_vm4, %v885_v31, 0 }
 0x244   : > { %939 = vmatpush.bf16.msra.mxu1 %v930_v32 }
 0x29e   : > { %v839_v9 = vpop.f32.mrf.mxu2 }
 0x29f   : > { %v840_v10 = vadd.f32 %v1338_v7, %v839_v9 }
 0x2a1   : > { %v852_v12 = vsel %vm766_vm3, %v840_v10, -inf }
 0x2a2   : > { %853 = vmax.xlane.f32.xlu0 %v852_v12  ;;  %v820_v17 = vpop.f32.mrf.mxu1  ;;  %v1240_v12 = vld [vmem:[#allocation7] sm:$0xff] }
 0x2a3   : > { %v801_v18 = vpop.f32.mrf.mxu0  ;;  %v821_v19 = vadd.f32 %v1338_v7, %v820_v17 }
 0x2a4   : > { %v802_v22 = vadd.f32 %v1338_v7, %v801_v18 }
 0x2a5   : > { %v849_v26 = vsel %vm766_vm3, %v821_v19, -inf }
 0x2a6   : > { %v841_v13 = vpop.f32.mrf.mxu2  ;;  %850 = vmax.xlane.f32.xlu1 %v849_v26  ;;  %v846_v28 = vsel %vm766_vm3, %v802_v22, -inf }
 0x2a7   : > { %847 = vmax.xlane.f32.xlu2 %v846_v28 }
 0x2aa   : > { %v822_v29 = vpop.f32.mrf.mxu1 }
 0x2ab   : > { %v803_v30 = vpop.f32.mrf.mxu0 }
 0x2b1   : > { %v782_v33 = vpop.f32.mrf.mxu3 }
 0x2b2   : > { %v783_v15 = vadd.f32 %v1338_v7, %v782_v33 }
 0x2b4   : > { %v843_v34 = vsel %vm766_vm3, %v783_v15, -inf }
 0x2b5   : > { %844 = vmax.xlane.f32.xlu2 %v843_v34 }
 0x2b9   : > { %v784_v35 = vpop.f32.mrf.mxu3 }
 0x315   : > { %v854_v36 = vpop.xlane.xlu0 %853 }
 0x316   : > { %v858_v37 = vsub.f32 %v840_v10, %v854_v36  ;;  %v1241_v10 = vld [vmem:[#allocation7 + $0x8] sm:$0xff] }
 0x317   : > { %1019 = vmatpush.bf16.msra.mxu3 %v1241_v10 }
 0x318   : > { %v865_v38 = vmul.f32 1.442695, %v858_v37 }
 0x319   : > { %v851_v39 = vpop.xlane.xlu1 %850 }
 0x31a   : > { %1340 = vpow2.f32 %v865_v38  ;;  %v857_v40 = vsub.f32 %v821_v19, %v851_v39  ;;  %v848_v41 = vpop.xlane.xlu2 %847 }
 0x31b   : > { %v856_v14 = vsub.f32 %v802_v22, %v848_v41  ;;  %1020 = vmatpush.bf16.msra.mxu3 %v1240_v12 }
 0x31c   : > { %v863_v42 = vmul.f32 1.442695, %v857_v40 }
 0x31d   : > { %v861_v43 = vmul.f32 1.442695, %v856_v14 }
 0x31e   : > { %1342 = vpow2.f32 %v863_v42 }
 0x31f   : > { %1344 = vpow2.f32 %v861_v43 }
 0x320   : > { %v1341_v44 = vpop.eup %1340 }
 0x321   : > { %v882_v45 = vpack.c.bf16 %v1341_v44, %v1341_v44  ;;  %v876_v54 = vsel %vm766_vm3, %v1341_v44, 0.0 }
 0x323   : > { %1220 = vmatmul.msk.bf16.vlgmr.msra.gmra.mxu2 %vm766_vm3, %v882_v45 }
 0x324   : > { %v1343_v46 = vpop.eup %1342 }
 0x325   : > { %v1345_v6 = vpop.eup %1344  ;;  %v881_v47 = vpack.c.bf16 %v1343_v46, %v1343_v46  ;;  %v873_v48 = vsel %vm766_vm3, %v1343_v46, 0.0 }
 0x326   : > { %v880_v49 = vpack.c.bf16 %v1345_v6, %v1345_v6  ;;  %874 = vadd.xlane.f32.xlu2 %v873_v48  ;;  %v870_v50 = vsel %vm766_vm3, %v1345_v6, 0.0 }
 0x327   : > { %871 = vadd.xlane.f32.xlu0 %v870_v50  ;;  %1219 = vmatmul.msk.bf16.vlgmr.msra.gmra.mxu1 %vm766_vm3, %v881_v47 }
 0x328   : > { %1218 = vmatmul.msk.bf16.vlgmr.msra.gmra.mxu0 %vm766_vm3, %v880_v49  ;;  %v845_v51 = vpop.xlane.xlu2 %844 }
 0x329   : > { %v855_v52 = vsub.f32 %v783_v15, %v845_v51 }
 0x32b   : > { %v859_v53 = vmul.f32 1.442695, %v855_v52 }
 0x32d   : > { %1346 = vpow2.f32 %v859_v53 }
 0x32f   : > { %877 = vadd.xlane.f32.xlu0 %v876_v54 }
 0x333   : > { %v1347_v24 = vpop.eup %1346 }
 0x334   : > { %v867_v55 = vsel %vm766_vm3, %v1347_v24, 0.0  ;;  %v879_v56 = vpack.c.bf16 %v1347_v24, %v1347_v24 }
 0x335   : > { %868 = vadd.xlane.f32.xlu2 %v867_v55 }
 0x336   : > { %1217 = vmatmul.msk.bf16.vlgmr.msrb.gmra.mxu3 %vm766_vm3, %v879_v56 }
 0x399   : > { %v875_v57 = vpop.xlane.xlu2 %874 }
 0x39a   : > { %v872_v21 = vpop.xlane.xlu0 %871  ;;  %1348 = vrcp.f32 %v875_v57 }
 0x39b   : > { %1350 = vrcp.f32 %v872_v21 }
 0x3a0   : > { %v1349_v59 = vpop.eup %1348 }
 0x3a1   : > { %v1351_v61 = vpop.eup %1350 }
 0x3a2   : > { %v878_v58 = vpop.xlane.xlu0 %877 }
 0x3a3   : > { %1352 = vrcp.f32 %v878_v58 }
 0x3a4   : > { %v941_v60 = vpop.f32.mrf.mxu1 }
 0x3a5   : > { %v922_v62 = vpop.f32.mrf.mxu0  ;;  %v970_v63 = vmul.f32 %v1349_v59, %v941_v60 }
 0x3a6   : > { %v969_v0 = vmul.f32 %v1351_v61, %v922_v62  ;;  %v960_v1 = vpop.f32.mrf.mxu2 }
 0x3a7   : > { %977 = vrot.lane.b32.xlu1 %v970_v63, %s1513_s13  ;;  %s1043_s13 = sshll.u32 %s1039_s26, 4  ;;  %s1044_s13 = int_to_ptr.hbm [resolvable:$true] %s1043_s13 }
 0x3a8   : > { %973 = vrot.lane.b32.xlu0 %v969_v0, %s1514_s29  ;;  %v869_v16 = vpop.xlane.xlu2 %868  ;;  %s1430_s29 = sshra.s32 %s1044_s13, 4  ;;  %s1431_s29 = int_to_ptr.hbm [resolvable:$true] %s1430_s29 }
 0x3a9   : > { %v1353_v2 = vpop.eup %1352  ;;  %1354 = vrcp.f32 %v869_v16  ;;  %p1437_p5 = scmp.lt.s32.totalorder %s1431_s29, %s1897_s9 }
 0x3aa   : > { %v971_v3 = vmul.f32 %v1353_v2, %v960_v1 }
 0x3ac   : > { %981 = vrot.lane.b32.xlu2 %v971_v3, %s1515_s24  ;;  %v943_v4 = vpop.f32.mrf.mxu1  ;;  %s1432_s24 = scalar_lea.hbm %s1431_s29, 8 }
 0x3ad   : > { %v924_v5 = vpop.f32.mrf.mxu0  ;;  %p1433_p1 = scmp.ne.s32.totalorder %s1431_s29, %s1432_s24  ;;  %p1438_p6 = scmp.lt.s32.totalorder %s1436_s15, %s1432_s24 }
 0x3ae   : > { %v962_v8 = vpop.f32.mrf.mxu2 }
 0x3af   : > { %v1355_v17 = vpop.eup %1354  ;;  %p1434_p2 = pnand %p1433_p1, %p1606_p4  ;;  %p1439_p7 = por %p1438_p6, %p1437_p5 }
 0x3b1   : > { %p1435_p3 = pneg %p1434_p2 }
 0x3b3   : > { %p1440_p9 = pnand %p1439_p7, %p1435_p3 }
 0x3b9   : > { %v903_v7 = vpop.f32.mrf.mxu3 }
 0x3ba   : > { %v968_v11 = vmul.f32 %v1355_v17, %v903_v7 }
 0x3c1   : > { %v905_v9 = vpop.f32.mrf.mxu3 }
 0x406   : > { %v982_v22 = vpop.permute.xlu2 %981 }
 0x419   : > { %v978_v18 = vpop.permute.xlu1 %977 }
 0x41a   : > { %v974_v19 = vpop.permute.xlu0 %973 }
 0x41b   : > { %v984_v20 = vsel %vm766_vm3, %v968_v11, %v974_v19 }
 0x41c   : > { %v986_v23 = vsel %vm985_vm5, %v984_v20, %v978_v18 }
 0x41d   : > { %v988_v25 = vsel %vm987_vm6, %v986_v23, %v982_v22 }
 0x41e   : > { %v989_v26 = vpack.c.bf16 %v988_v25, %v988_v25 }
 0x420   : > { %1229 = vmatmul.msk.bf16.vlgmr.msra.gmra.mxu3 %vm448_vm0, %v989_v26 }
 0x4a3   : > { %v1022_v13 = vpop.f32.mrf.mxu3 }
 0x4a4   : > { %v1023_v28 = vadd.f32 %v1339_v27, %v1022_v13 }
 0x4a6   : > { %1026 = vst.msk [vmem:[%s408_s17] sm:$0xff] %vm448_vm0, %v1023_v28 }
 0x4a7   : > { %1443 = shalt.err (!%p1440_p9)
}
 0x4a8   : > { %1250 = dma.vmem_to_hbm [thread:$0]  (%p1606_p4), %s1042_s23, 128, %s1044_s13, %s1028_s12  }
 0x4ab   : > { %v1024_v29 = vpop.f32.mrf.mxu3 }
 0x4ac PF: > { %p1267_p10 = scmp.ge.s32.totalorder %s1502_s14, 2  ;;  %s1055_s16 = sand.u32 1, %s1482_s30  }
 0x4ad   : > { %s1056_s27 = scalar_lea.sflag [#allocation6], %s1055_s16 }
 0x4ae   : > { %p1260_p11 = pnand %p1267_p10, %p1613_p8 }
 0x4b0   : > { %p1261_p12 = pneg %p1260_p11 }
 0x4b2   : > { %1477 = dma.done.wait (%p1261_p12), %s1056_s27, 128  }
 0x4b3   : > { %1479 = vsyncadd (%p1261_p12), %s1056_s27, 4294967168  ;;  %s24_s14 = sadd.s32 1, %s1502_s14   ;;  %s1906_s12 = sld [smem:[#allocation13_spill]] }
 0x4b4   : > { %p21_p13 = scmp.ge.s32.totalorder %s24_s14, 4   ;;  %s1907_s13 = sld [smem:[#allocation14_spill]] }
 0x4b5   : > { %s1908_s30 = smov %s1486_s10  ;;  %s1909_s10 = smov %s1490_s11 }
 0x4b6   : > { %s1910_s11 = smov %s1619_s22  ;;  %23 = sbr.rel (!%p21_p13) target bundleno = 6 (0x6), region = 116 }
 0x4bb   :  { %1062 = vsyncpa [#allocation5], 1 }
 0x4bc   :  { %1064 = vsyncpa [#allocation5 + $0x1], 1 }
 0x4bd   :  { %1065 = vsyncpa [#allocation8], 1 }
 0x4be   :  { %1066 = vsyncpa [#allocation6], 1 }
 0x4bf   :  { %1068 = vsyncpa [#allocation6 + $0x1], 1 }

</bundles_post_ra>
